<compile_context>
chip_gen: v5e
topology: v5e:2x2
jax: 0.10.0
libtpu: 0.0.40
codegen_flags: <defaults>
</compile_context>

<pallas_src>
import functools

import jax
import jax.numpy as jnp
from jax import lax
from jax.experimental import pallas as pl
from jax.experimental.pallas import tpu as pltpu


def _round_up(x, m):
    return ((x + m - 1) // m) * m


def _round_down(x, m):
    return (x // m) * m


def _ce_partial_kernel(
    logits_ref, targets_ref, partial_ref, m_ref, l_ref, t_ref, *,
    n_total, c_total, block_rows, block_cols, num_class_blocks,
):
    """Per-row-block partial sum of -log softmax[target].

    logits_ref:  (TN, TC) input-dtype VMEM tile (cast to f32 in-register).
    targets_ref: (TN, 1)  int32 VMEM tile.
    partial_ref: (1, 1)   f32 SMEM block of the (row_blocks, 1) output.
    m/l/t_ref:   (TN, 1)  f32 VMEM scratch (running max / denom / target
                 logit); only used when the class dim is tiled.
    """
    i = pl.program_id(0)
    logits = logits_ref[...].astype(jnp.float32)          # (TN, TC)
    tgt = targets_ref[...]                                  # (TN, 1) int32

    row_ids = i * block_rows + lax.broadcasted_iota(
        jnp.int32, (block_rows, 1), 0)

    if num_class_blocks == 1:
        # Whole class dim resident: plain stable logsumexp, no scratch merge.
        col_ids = lax.broadcasted_iota(jnp.int32, (1, block_cols), 1)
        row_max = jnp.max(logits, axis=1, keepdims=True)
        denom = jnp.sum(jnp.exp(logits - row_max), axis=1, keepdims=True)
        # Target logit gathered from the raw (cast) logits, not the shifted
        # copy: nll = log(denom) + row_max - logits[target].
        tgt_logit = jnp.sum(
            jnp.where(col_ids == tgt, logits, 0.0), axis=1, keepdims=True)
        nll = jnp.log(denom) + row_max - tgt_logit
        nll = jnp.where(row_ids < n_total, nll, 0.0)        # ragged last rows
        partial_ref[0, 0] = jnp.sum(nll)
        return

    # ---- class-tiled path: online logsumexp over the "arbitrary" axis ----
    j = pl.program_id(1)

    @pl.when(j == 0)
    def _():
        m_ref[...] = jnp.full_like(m_ref, -jnp.inf)
        l_ref[...] = jnp.zeros_like(l_ref)
        t_ref[...] = jnp.zeros_like(t_ref)

    col_ids = j * block_cols + lax.broadcasted_iota(
        jnp.int32, (1, block_cols), 1)

    if c_total % block_cols != 0:
        # Ragged last class block: padded lanes must not feed the reductions.
        logits = jnp.where(col_ids < c_total, logits, -jnp.inf)

    m_prev = m_ref[...]
    m_new = jnp.maximum(m_prev, jnp.max(logits, axis=1, keepdims=True))
    l_ref[...] = l_ref[...] * jnp.exp(m_prev - m_new) + jnp.sum(
        jnp.exp(logits - m_new), axis=1, keepdims=True)
    m_ref[...] = m_new

    # Raw target logit: matches at most one lane per row across all class
    # blocks (masked lanes have col_ids >= c_total > target, so never match).
    t_ref[...] = t_ref[...] + jnp.sum(
        jnp.where(col_ids == tgt, logits, 0.0), axis=1, keepdims=True)

    @pl.when(j == num_class_blocks - 1)
    def _():
        nll = jnp.log(l_ref[...]) + m_ref[...] - t_ref[...]
        nll_masked = jnp.where(row_ids < n_total, nll, 0.0)
        partial_ref[0, 0] = jnp.sum(nll_masked)


def cross_entropy_loss(logits, targets, *, vmem_budget_bytes=None):
    """logits: (N, C) float (f32/bf16), targets: (N,) int -> scalar f32 loss."""
    n, c = logits.shape
    itemsize = jnp.dtype(logits.dtype).itemsize
    targets_2d = targets.astype(jnp.int32).reshape(n, 1)

    # Sublane tile for the input dtype: 8 rows (f32), 16 (bf16), 32 (int8/fp8).
    sublane = max(8, 32 // itemsize)
    n_rounded = max(sublane, _round_up(n, sublane))

    # Per-generation VMEM budget: v7x has 64 MiB/TC, v5e/v6e 128 MiB; keep
    # ~25% headroom for compiler scratch / semaphores / pipelining state.
    if vmem_budget_bytes is None:
        try:
            cap = int(pltpu.get_tpu_info().vmem_capacity_bytes)
        except Exception:
            cap = 64 * 1024 * 1024          # conservative (v7x-safe) fallback
        vmem_budget_bytes = min((cap * 3) // 4, 96 * 1024 * 1024)
    vmem_budget_bytes = int(vmem_budget_bytes)

    # Real per-tile footprint per (row, class) element: double-buffered input
    # plus ~3 live f32 (TN, TC) temporaries (cast copy, exp, one-hot select).
    bytes_per_elem = 2 * itemsize + 3 * 4
    min_rows = 256   # desired row-block size before we start tiling classes

    rows_full_c = _round_down(vmem_budget_bytes // (c * bytes_per_elem), sublane)
    if rows_full_c >= min(min_rows, n_rounded):
        block_cols = c                      # whole class dim per tile
        block_rows = min(rows_full_c, n_rounded)
    else:
        # Vocab-scale C: tile the lane (class) axis in 128-multiples and run
        # an online logsumexp across class blocks.
        c_pad128 = _round_up(c, 128)
        block_cols = _round_down(
            vmem_budget_bytes // (min_rows * bytes_per_elem), 128)
        block_cols = max(128, min(block_cols, c_pad128))
        block_rows = _round_down(
            vmem_budget_bytes // (block_cols * bytes_per_elem), sublane)
        block_rows = max(sublane, min(block_rows, n_rounded))

    # Megacore (v7x has 2 TCs): make sure the "parallel" row axis has >= 2
    # blocks whenever the batch can be split.
    if pl.cdiv(n_rounded, block_rows) == 1 and n_rounded >= 2 * sublane:
        block_rows = _round_up(max(sublane, n_rounded // 2), sublane)

    num_row_blocks = pl.cdiv(n, block_rows)
    num_class_blocks = pl.cdiv(c, block_cols)

    kernel = functools.partial(
        _ce_partial_kernel,
        n_total=n, c_total=c,
        block_rows=block_rows, block_cols=block_cols,
        num_class_blocks=num_class_blocks,
    )

    cost = pl.CostEstimate(
        flops=6 * n * c,
        transcendentals=n * c,
        bytes_accessed=n * c * itemsize + n * 4 + num_row_blocks * 4,
    )

    partials = pl.pallas_call(
        kernel,
        out_shape=jax.ShapeDtypeStruct((num_row_blocks, 1), jnp.float32),
        grid_spec=pltpu.PrefetchScalarGridSpec(
            num_scalar_prefetch=0,
            grid=(num_row_blocks, num_class_blocks),
            in_specs=[
                # Logits tile: (TN, TC), advances with both grid axes.
                pl.BlockSpec((block_rows, block_cols), lambda i, j: (i, j)),
                # Targets row-block: (TN, 1) int32 column, row axis only.
                pl.BlockSpec((block_rows, 1), lambda i, j: (i, 0)),
            ],
            # One (1,1) partial sum per row-block, written to SMEM at the
            # last class block.
            out_specs=pl.BlockSpec(
                (1, 1), lambda i, j: (i, 0), memory_space=pltpu.SMEM),
            scratch_shapes=[pltpu.VMEM((block_rows, 1), jnp.float32)] * 3,
        ),
        compiler_params=pltpu.CompilerParams(
            dimension_semantics=("parallel", "arbitrary"),
            vmem_limit_bytes=max(vmem_budget_bytes, 32 * 1024 * 1024),
        ),
        cost_estimate=cost,
    )(logits, targets_2d)

    return jnp.sum(partials) / jnp.float32(n)


if __name__ == "__main__":
    key = jax.random.PRNGKey(0)
    k1, k2, k3, k4 = jax.random.split(key, 4)

    def reference(lg, tg):
        # Same math as the torch module, in plain JAX.
        row_max = jnp.max(lg, axis=1, keepdims=True)
        ex = jnp.exp(lg - row_max)
        probs = ex / jnp.sum(ex, axis=1, keepdims=True)
        return jnp.mean(-jnp.log(probs[jnp.arange(lg.shape[0]), tg]))

    # 1) Small full-C-resident case (matches the torch example scale).
    batch, num_classes = 8, 16
    logits = jax.random.normal(k1, (batch, num_classes), dtype=jnp.float32)
    targets = jax.random.randint(k2, (batch,), 0, num_classes, dtype=jnp.int32)
    loss = cross_entropy_loss(logits, targets)
    jax.block_until_ready(loss)
    ref = reference(logits, targets)
    assert jnp.allclose(loss, ref, atol=1e-4, rtol=1e-4), (loss, ref)

    # 2) Force the class-tiled online-logsumexp path (ragged row block and
    #    ragged class block) by shrinking the VMEM budget for the test.
    batch2, num_classes2 = 13, 400
    logits2 = jax.random.normal(k3, (batch2, num_classes2), dtype=jnp.float32)
    targets2 = jax.random.randint(
        k4, (batch2,), 0, num_classes2, dtype=jnp.int32)
    loss2 = cross_entropy_loss(logits2, targets2, vmem_budget_bytes=60_000)
    jax.block_until_ready(loss2)
    ref2 = reference(logits2, targets2)
    assert jnp.allclose(loss2, ref2, atol=1e-4, rtol=1e-4), (loss2, ref2)

    print("KERNEL_OK")
</pallas_src>

<mosaic_0001>
module attributes {stable_mosaic.version = 11 : i64} {
  func.func @_ce_partial_kernel(%arg0: i32, %arg1: i32, %arg2: memref<8x16xf32, #tpu.memory_space<vmem>>, %arg3: memref<8x1xi32, #tpu.memory_space<vmem>>, %arg4: memref<1x1xf32, #tpu.memory_space<smem>>, %arg5: memref<8x1xf32, #tpu.memory_space<vmem>>, %arg6: memref<8x1xf32, #tpu.memory_space<vmem>>, %arg7: memref<8x1xf32, #tpu.memory_space<vmem>>) attributes {dimension_semantics = [#tpu.dimension_semantics<parallel>, #tpu.dimension_semantics<arbitrary>], iteration_bounds = array<i64: 1, 1>, scalar_prefetch = 0 : i64, scratch_operands = 3 : i64, tpu.core_type = #tpu.core_type<tc>, window_params = [{transform_indices = @transform_0, window_bounds = array<i64: 8, 16>}, {transform_indices = @transform_1, window_bounds = array<i64: 8, 1>}, {transform_indices = @transform_2, window_bounds = array<i64: 1, 1>}]} {
    %c0 = arith.constant 0 : index
    %c0_0 = arith.constant 0 : index
    %0 = vector.load %arg2[%c0, %c0_0] : memref<8x16xf32, #tpu.memory_space<vmem>>, vector<8x16xf32>
    %c0_1 = arith.constant 0 : index
    %c0_2 = arith.constant 0 : index
    %1 = vector.load %arg3[%c0_1, %c0_2] : memref<8x1xi32, #tpu.memory_space<vmem>>, vector<8x1xi32>
    %c8_i32 = arith.constant 8 : i32
    %2 = arith.muli %arg0, %c8_i32 : i32
    %3 = tpu.iota {dimensions = array<i32: 0>} : vector<8x1xi32>
    %4 = vector.broadcast %2 : i32 to vector<8x1xi32>
    %5 = arith.addi %4, %3 : vector<8x1xi32>
    %6 = tpu.iota {dimensions = array<i32: 1>} : vector<1x16xi32>
    %cst = arith.constant dense<0xFF800000> : vector<8xf32>
    %7 = vector.multi_reduction <maximumf>, %0, %cst [1] : vector<8x16xf32> to vector<8xf32>
    %8 = vector.shape_cast %7 : vector<8xf32> to vector<8x1xf32>
    %9 = vector.broadcast %8 : vector<8x1xf32> to vector<8x16xf32>
    %10 = arith.subf %0, %9 : vector<8x16xf32>
    %11 = math.exp %10 : vector<8x16xf32>
    %cst_3 = arith.constant dense<0.000000e+00> : vector<8xf32>
    %12 = vector.multi_reduction <add>, %11, %cst_3 [1] : vector<8x16xf32> to vector<8xf32>
    %13 = vector.shape_cast %12 : vector<8xf32> to vector<8x1xf32>
    %14 = vector.broadcast %6 : vector<1x16xi32> to vector<8x16xi32>
    %15 = vector.broadcast %1 : vector<8x1xi32> to vector<8x16xi32>
    %16 = arith.cmpi eq, %14, %15 : vector<8x16xi32>
    %cst_4 = arith.constant 0.000000e+00 : f32
    %17 = vector.broadcast %cst_4 : f32 to vector<8x16xf32>
    %18 = arith.select %16, %0, %17 : vector<8x16xi1>, vector<8x16xf32>
    %cst_5 = arith.constant dense<0.000000e+00> : vector<8xf32>
    %19 = vector.multi_reduction <add>, %18, %cst_5 [1] : vector<8x16xf32> to vector<8xf32>
    %20 = vector.shape_cast %19 : vector<8xf32> to vector<8x1xf32>
    %21 = math.log %13 : vector<8x1xf32>
    %22 = arith.addf %21, %8 : vector<8x1xf32>
    %23 = arith.subf %22, %20 : vector<8x1xf32>
    %c8_i32_6 = arith.constant 8 : i32
    %24 = vector.broadcast %c8_i32_6 : i32 to vector<8x1xi32>
    %25 = arith.cmpi slt, %5, %24 : vector<8x1xi32>
    %cst_7 = arith.constant 0.000000e+00 : f32
    %26 = vector.broadcast %cst_7 : f32 to vector<8x1xf32>
    %27 = arith.select %25, %23, %26 : vector<8x1xi1>, vector<8x1xf32>
    %28 = vector.shape_cast %27 : vector<8x1xf32> to vector<1x8x1xf32>
    %cst_8 = arith.constant dense<0.000000e+00> : vector<1xf32>
    %29 = vector.multi_reduction <add>, %28, %cst_8 [1, 2] : vector<1x8x1xf32> to vector<1xf32>
    %30 = vector.shape_cast %29 : vector<1xf32> to vector<1x1x1xf32>
    %31 = vector.extract %30[0, 0, 0] : f32 from vector<1x1x1xf32>
    %c0_9 = arith.constant 0 : index
    %c0_10 = arith.constant 0 : index
    %32 = memref.load %arg4[%c0_9, %c0_10] : memref<1x1xf32, #tpu.memory_space<smem>>
    memref.store %31, %arg4[%c0_9, %c0_10] : memref<1x1xf32, #tpu.memory_space<smem>>
    return
  }
  func.func @transform_0(%arg0: i32, %arg1: i32) -> (i32, i32) {
    %c0_i32 = arith.constant 0 : i32
    return %arg0, %arg1 : i32, i32
  }
  func.func @transform_1(%arg0: i32, %arg1: i32) -> (i32, i32) {
    %c0_i32 = arith.constant 0 : i32
    %c0_i32_0 = arith.constant 0 : i32
    return %arg0, %c0_i32 : i32, i32
  }
  func.func @transform_2(%arg0: i32, %arg1: i32) -> (i32, i32) {
    %c0_i32 = arith.constant 0 : i32
    %c0_i32_0 = arith.constant 0 : i32
    return %arg0, %c0_i32 : i32, i32
  }
}

</mosaic_0001>

<bundles_post_ra>
// kernel: tpu_custom_call.1
= control target key start
LH: loop header
LB: loop body
LE: loop exit
PB: predicated region body
PF: predicated region fallthrough
CT: control target
= control target key end

     0   :  { %vm21_vm0 = vcmask 130048   ;;  %s125_s0 = inlined_call_operand.vmem [shape: f32[8,16], index: 0, kind: input, shape index: {}]   ;;  %s126_s1 = inlined_call_operand.vmem [shape: s32[8,1], index: 1, kind: input, shape index: {}]   ;;  %s127_s2 = inlined_call_operand.hbm [shape: f32[1,1], index: 2, kind: output, shape index: {}]  }
   0x1   :  { %v12_v0 = vld [vmem:[%s125_s0] sm:$0xff] }
   0x2   :  { %7 = vsyncpa [#allocation6], 0  ;;  %v22_v1 = vsel %vm21_vm0, %v12_v0, -inf  ;;  %v96_v2 = vmov 0   ;;  %v13_v3 = vld [vmem:[%s126_s1] sm:$0xff]  ;;  %v19_v9 = vlaneseq  ;;  %vm45_vm2 = vcmask 7168  }
   0x3   :  { %77 = vset.pattern.permute.xlu0 %v96_v2  ;;  %s63_s13 = sshll.u32 %s127_s2, 4  ;;  %s97_s15 = smov [#allocation5]   ;;  %s64_s13 = int_to_ptr.hbm [resolvable:$true] %s63_s13 }
   0x4   :  { %23 = vmax.xlane.f32.xlu0 %v22_v1  ;;  %v20_v10 = vand.u32 127, %v19_v9 }
  0x18   :  { %32 = vperm.xlu0 %77, %v13_v3  }
  0x77   :  { %v24_v4 = vpop.xlane.xlu0 %23 }
  0x78   :  { %v25_v5 = vsub.f32 %v12_v0, %v24_v4 }
  0x7a   :  { %v26_v6 = vmul.f32 1.442695, %v25_v5 }
  0x7c   :  { %78 = vpow2.f32 %v26_v6 }
  0x82   :  { %v79_v7 = vpop.eup %78 }
  0x83   :  { %v28_v8 = vsel %vm21_vm0, %v79_v7, 0.0 }
  0x84   :  { %29 = vadd.xlane.f32.xlu1 %v28_v8 }
  0x8a   :  { %v33_v11 = vpop.permute.xlu0 %32 }
  0x8b   :  { %vm34_vm1 = vcmp.eq.s32.totalorder %v20_v10, %v33_v11 }
  0x8c   :  { %v35_v12 = vsel %vm34_vm1, %v12_v0, 0.0 }
  0x8d   :  { %v36_v13 = vsel %vm21_vm0, %v35_v12, 0.0 }
  0x8e   :  { %37 = vadd.xlane.f32.xlu1 %v36_v13 }
  0xf7   :  { %v30_v14 = vpop.xlane.xlu1 %29 }
  0xf8   :  { %80 = vlog2.f32 %v30_v14 }
  0xfe   :  { %v81_v15 = vpop.eup %80 }
  0xff   :  { %v40_v16 = vmul.f32 0.6931472, %v81_v15 }
 0x101   :  { %v41_v17 = vadd.f32 %v40_v16, %v24_v4  ;;  %v38_v18 = vpop.xlane.xlu1 %37 }
 0x103   :  { %v42_v19 = vsub.f32 %v41_v17, %v38_v18 }
 0x105   :  { %v46_v20 = vsel %vm45_vm2, %v42_v19, 0.0 }
 0x106   :  { %47 = vadd.xlane.f32.xlu2 %v46_v20 }
 0x179   :  { %v48_v21 = vpop.xlane.xlu2 %47 }
 0x17a   :  { %v49_v22 = vrot.slane %v48_v21, 4 }
 0x17c   :  { %v50_v23 = vadd.f32 %v49_v22, %v48_v21 }
 0x17e   :  { %v51_v24 = vrot.slane %v50_v23, 2 }
 0x180   :  { %v52_v25 = vadd.f32 %v51_v24, %v50_v23 }
 0x182   :  { %v53_v26 = vrot.slane %v52_v25, 1 }
 0x184   :  { %v54_v27 = vadd.f32 %v53_v26, %v52_v25 }
 0x186   :  { %73 = vpush %v54_v27 }
 0x1b7   :  { %s74_s14 = spop %73 }
 0x1b8   :  { %57 = sst [smem:[#allocation5]] %s74_s14 }
 0x1b9   :  { %66 = dma.smem_to_hbm %s97_s15, 16, %s64_s13, [#allocation6]  }
 0x1ba   :  { %94 = dma.done.wait [#allocation6], 16  }
 0x1bb   :  { %95 = vsyncadd [#allocation6], 4294967280 }
 0x1bc   :  { %71 = sfence }
 0x1bd   :  { %72 = vsyncpa [#allocation6], 1 }

</bundles_post_ra>
